<compile_context>
chip_gen: v7x
topology: tpu7x:2x2x1
jax: 0.10.0
libtpu: 0.0.40
codegen_flags: <defaults>
</compile_context>

<pallas_src>
import functools

import jax
import jax.numpy as jnp
from jax.experimental import pallas as pl
from jax.experimental.pallas import tpu as pltpu


def build_prompt_template(token_prefix, token_suffix, n_ctx):
    """Init-time analogue of register_buffer: [prefix | 0-ctx rows | suffix]."""
    n_cls, _, dim = token_prefix.shape
    ctx_rows = jnp.zeros((n_cls, n_ctx, dim), dtype=token_prefix.dtype)
    return jnp.concatenate([token_prefix, ctx_rows, token_suffix], axis=1)


def text_prompt_learner_forward(prompt_template, ctx, *, cls_tile=None):
    """Pallas implementation of TextPromptLearner.forward().

    prompt_template: (n_cls, 1 + n_ctx + n_suffix, dim)  frozen prefix/suffix
        template.  Donate it; the returned `prompts` aliases this buffer (in a
        training loop, feed it back in as the next call's template).
    ctx:             (n_layers, n_ctx, dim)  learned parameter.

    Returns (prompts, ctx), matching the PyTorch module.
    """
    n_cls, total_len, dim = prompt_template.shape
    n_layers, n_ctx, ctx_dim = ctx.shape
    assert ctx_dim == dim and total_len >= 1 + n_ctx

    # Size the class tile so the staging buffer is a couple of MiB: fat strided
    # DMAs, few grid steps, and far below the default scoped-VMEM limit on
    # every chip (v5e 16 MiB / v6e 32 MiB / v7x 32 MiB).
    itemsize = jnp.dtype(prompt_template.dtype).itemsize
    if cls_tile is None:
        cls_tile = max(1, (2 << 20) // (n_ctx * dim * itemsize))
    cls_tile = int(max(1, min(cls_tile, n_cls)))
    num_tiles = -(-n_cls // cls_tile)
    ragged = (n_cls % cls_tile) != 0

    def kernel(ctx_ref, tmpl_ref, out_ref, ctx_buf, sems):
        # tmpl_ref exists only so the template HBM buffer is aliased to out_ref.
        del tmpl_ref
        i = pl.program_id(0)
        slot = i % 2
        last = num_tiles - 1

        def dst(first_cls):
            return out_ref.at[pl.ds(first_cls, cls_tile), pl.ds(1, n_ctx), :]

        def retire(sem_slot):
            # Wait descriptors only need a dst of matching shape/strides.
            pltpu.make_async_copy(ctx_buf, dst(0), sems.at[sem_slot]).wait()

        # Stage broadcast(ctx[0]) across the class tile once; never rewritten,
        # so in-flight DMAs may keep reading it on later steps.
        @pl.when(i == 0)
        def _():
            ctx_buf[...] = jnp.broadcast_to(
                ctx_ref[...].astype(ctx_buf.dtype)[None], ctx_buf.shape)

        # Keep two tile-DMAs in flight: before reusing a semaphore slot, retire
        # the copy issued two steps ago.
        if num_tiles > 2:
            @pl.when(i >= 2)
            def _():
                retire(slot)

        # The last tile is clamped so every DMA has the same static size; when
        # that makes it overlap the previous tile, retire the previous DMA
        # first so overlapping rows are never written concurrently.
        if ragged and num_tiles > 1:
            @pl.when(i == last)
            def _():
                retire(1 - slot)

        c0 = jnp.minimum(i * cls_tile, n_cls - cls_tile)
        pltpu.make_async_copy(ctx_buf, dst(c0), sems.at[slot]).start()

        # Drain on the final step so no DMA outlives the kernel.
        @pl.when(i == last)
        def _():
            retire(slot)
            if num_tiles > 1 and not ragged:
                retire(1 - slot)

    prompts = pl.pallas_call(
        kernel,
        out_shape=jax.ShapeDtypeStruct((n_cls, total_len, dim),
                                       prompt_template.dtype),
        grid_spec=pltpu.PrefetchScalarGridSpec(
            num_scalar_prefetch=0,
            grid=(num_tiles,),
            in_specs=[
                # Layer-0 ctx block: pinned to (0, 0, 0) so it is DMA'd into
                # VMEM once and stays resident across all grid steps; no
                # wrapper-side ctx[0] copy is materialized in HBM.
                pl.BlockSpec((pl.Squeezed(), n_ctx, dim), lambda i: (0, 0, 0)),
                # Frozen template stays in HBM (no auto-DMA); aliased to out.
                pl.BlockSpec(memory_space=pl.ANY),
            ],
            out_specs=pl.BlockSpec(memory_space=pl.ANY),
            scratch_shapes=[
                pltpu.VMEM((cls_tile, n_ctx, dim), prompt_template.dtype),
                pltpu.SemaphoreType.DMA((2,)),
            ],
        ),
        # In-place update: output buffer == template buffer, so prefix/suffix
        # rows are never re-read or re-written by the kernel.
        input_output_aliases={1: 0},
        compiler_params=pltpu.CompilerParams(
            # The DMA ring carries semaphore state across grid steps, so the
            # axis must run sequentially on one core.
            dimension_semantics=("arbitrary",),
        ),
    )(ctx, prompt_template)

    return prompts, ctx


def _reference(token_prefix, token_suffix, ctx):
    n_cls = token_prefix.shape[0]
    _, n_ctx, dim = ctx.shape
    return jnp.concatenate(
        [token_prefix,
         jnp.broadcast_to(ctx[0][None], (n_cls, n_ctx, dim)),
         token_suffix],
        axis=1,
    )


if __name__ == "__main__":
    # Small synthetic configuration (deterministic init, no checkpoint load).
    # TODO(synk): init-time clip.tokenize / token_embedding lookup is host-side
    # setup, replaced here by synthetic frozen prefix/suffix embeddings.
    n_ctx = 4        # TRAINER.COOP.TEXT_NCTX
    n_layers = 3     # TRAINER.COOP.TEXT_LAYER  (only layer 0 used in forward)
    ctx_dim = 128    # clip_model.ln_final.weight.shape[0]
    dtype = jnp.float32

    key = jax.random.PRNGKey(0)
    k_ctx, key = jax.random.split(key)
    ctx = (0.02 * jax.random.normal(k_ctx, (n_layers, n_ctx, ctx_dim))).astype(dtype)

    # (n_cls, total_len, cls_tile): exercise the single-tile path, the ragged
    # multi-tile path (pipelined DMA ring + clamped last tile), and the even
    # multi-tile path.
    configs = [(4, 16, None), (10, 16, 3), (8, 12, 4)]
    ok = True
    for n_cls, total_len, ct in configs:
        n_suffix = total_len - 1 - n_ctx
        k_pre, k_suf, key = jax.random.split(key, 3)
        token_prefix = jax.random.normal(k_pre, (n_cls, 1, ctx_dim)).astype(dtype)
        token_suffix = jax.random.normal(
            k_suf, (n_cls, n_suffix, ctx_dim)).astype(dtype)

        # Init-time template (register_buffer analogue), updated in place by
        # every forward call (donated so the aliasing is realized).
        template = build_prompt_template(token_prefix, token_suffix, n_ctx)
        fwd = jax.jit(
            functools.partial(text_prompt_learner_forward, cls_tile=ct),
            donate_argnums=(0,),
        )
        prompts, ctx_out = jax.block_until_ready(fwd(template, ctx))

        ref = _reference(token_prefix, token_suffix, ctx)
        ok &= prompts.shape == (n_cls, total_len, ctx_dim)
        ok &= ctx_out.shape == (n_layers, n_ctx, ctx_dim)
        ok &= bool(jnp.allclose(prompts, ref))
        ok &= bool(jnp.allclose(ctx_out, ctx))

    if ok:
        print("KERNEL_OK")
</pallas_src>

<mosaic_0001>
module attributes {stable_mosaic.version = 11 : i64} {
  func.func @kernel(%arg0: i32, %arg1: memref<1x4x128xf32, #tpu.memory_space<vmem>>, %arg2: memref<4x16x128xf32, #tpu.memory_space<any>>, %arg3: memref<4x16x128xf32, #tpu.memory_space<any>>, %arg4: memref<4x4x128xf32, #tpu.memory_space<vmem>>, %arg5: memref<2x!tpu.dma_semaphore, #tpu.memory_space<semaphore_mem>>) attributes {dimension_semantics = [#tpu.dimension_semantics<arbitrary>], iteration_bounds = array<i64: 1>, scalar_prefetch = 0 : i64, scratch_operands = 2 : i64, tpu.core_type = #tpu.core_type<tc>, window_params = [{transform_indices = @transform_0, window_bounds = array<i64: 1, 4, 128>}, {}, {}]} {
    %c2_i32 = arith.constant 2 : i32
    %c0_i32 = arith.constant 0 : i32
    %0 = arith.cmpi eq, %c2_i32, %c0_i32 : i32
    %c1_i32 = arith.constant 1 : i32
    %1 = arith.select %0, %c1_i32, %c2_i32 : i32
    %2 = arith.remsi %arg0, %1 : i32
    %c0_i32_0 = arith.constant 0 : i32
    %3 = arith.cmpi ne, %2, %c0_i32_0 : i32
    %c0_i32_1 = arith.constant 0 : i32
    %4 = arith.cmpi slt, %2, %c0_i32_1 : i32
    %c0_i32_2 = arith.constant 0 : i32
    %5 = arith.cmpi slt, %1, %c0_i32_2 : i32
    %6 = arith.xori %4, %5 : i1
    %7 = arith.andi %6, %3 : i1
    %8 = arith.addi %2, %1 : i32
    %9 = arith.select %7, %8, %2 : i32
    %c0_i32_3 = arith.constant 0 : i32
    %10 = arith.cmpi eq, %arg0, %c0_i32_3 : i32
    %11 = arith.extui %10 : i1 to i32
    %c0_i32_4 = arith.constant 0 : i32
    %12 = arith.cmpi ne, %11, %c0_i32_4 : i32
    scf.if %12 {
      %c0 = arith.constant 0 : index
      %c0_10 = arith.constant 0 : index
      %c0_11 = arith.constant 0 : index
      %21 = vector.load %arg1[%c0, %c0_10, %c0_11] : memref<1x4x128xf32, #tpu.memory_space<vmem>>, vector<1x4x128xf32>
      %22 = vector.shape_cast %21 : vector<1x4x128xf32> to vector<4x128xf32>
      %23 = vector.shape_cast %22 : vector<4x128xf32> to vector<1x4x128xf32>
      %24 = vector.shape_cast %23 : vector<1x4x128xf32> to vector<1x4x128xf32>
      %25 = vector.broadcast %24 : vector<1x4x128xf32> to vector<4x4x128xf32>
      %c0_12 = arith.constant 0 : index
      %c0_13 = arith.constant 0 : index
      %c0_14 = arith.constant 0 : index
      %26 = vector.load %arg4[%c0_12, %c0_13, %c0_14] : memref<4x4x128xf32, #tpu.memory_space<vmem>>, vector<4x4x128xf32>
      tpu.vector_store %arg4[%c0_12, %c0_13, %c0_14], %25 {strides = array<i32>} : memref<4x4x128xf32, #tpu.memory_space<vmem>>, vector<4x4x128xf32>,
    } else {
    }
    %c4_i32 = arith.constant 4 : i32
    %13 = arith.muli %arg0, %c4_i32 : i32
    %c0_i32_5 = arith.constant 0 : i32
    %14 = arith.minsi %13, %c0_i32_5 : i32
    %c1_i32_6 = arith.constant 1 : i32
    %c0_i32_7 = arith.constant 0 : i32
    %15 = tpu.memref_slice %arg3[%14, %c1_i32_6, %c0_i32_7] : memref<4x16x128xf32, #tpu.memory_space<any>> -> memref<4x4x128xf32, #tpu.memory_space<any>>
    %16 = tpu.memref_slice %arg5[%9] : memref<2x!tpu.dma_semaphore, #tpu.memory_space<semaphore_mem>> -> memref<1x!tpu.dma_semaphore, #tpu.memory_space<semaphore_mem>>
    %17 = tpu.memref_squeeze %16 : memref<1x!tpu.dma_semaphore, #tpu.memory_space<semaphore_mem>> -> memref<!tpu.dma_semaphore, #tpu.memory_space<semaphore_mem>>
    tpu.enqueue_dma source(%arg4 : memref<4x4x128xf32, #tpu.memory_space<vmem>>) target(%15 : memref<4x4x128xf32, #tpu.memory_space<any>>) target_semaphore(%17 : memref<!tpu.dma_semaphore, #tpu.memory_space<semaphore_mem>>)
    %c0_i32_8 = arith.constant 0 : i32
    %18 = arith.cmpi eq, %arg0, %c0_i32_8 : i32
    %19 = arith.extui %18 : i1 to i32
    %c0_i32_9 = arith.constant 0 : i32
    %20 = arith.cmpi ne, %19, %c0_i32_9 : i32
    scf.if %20 {
      %c0_i32_10 = arith.constant 0 : i32
      %c1_i32_11 = arith.constant 1 : i32
      %c0_i32_12 = arith.constant 0 : i32
      %21 = tpu.memref_slice %arg3[%c0_i32_10, %c1_i32_11, %c0_i32_12] : memref<4x16x128xf32, #tpu.memory_space<any>> -> memref<4x4x128xf32, #tpu.memory_space<any>>
      %22 = tpu.memref_slice %arg5[%9] : memref<2x!tpu.dma_semaphore, #tpu.memory_space<semaphore_mem>> -> memref<1x!tpu.dma_semaphore, #tpu.memory_space<semaphore_mem>>
      %23 = tpu.memref_squeeze %22 : memref<1x!tpu.dma_semaphore, #tpu.memory_space<semaphore_mem>> -> memref<!tpu.dma_semaphore, #tpu.memory_space<semaphore_mem>>
      tpu.wait_dma2 semaphore(%23 : memref<!tpu.dma_semaphore, #tpu.memory_space<semaphore_mem>>) src(%arg4 : memref<4x4x128xf32, #tpu.memory_space<vmem>>) dst(%21 : memref<4x4x128xf32, #tpu.memory_space<any>>)
    } else {
    }
    return
  }
  func.func @transform_0(%arg0: i32) -> (i32, i32, i32) {
    %c0_i32 = arith.constant 0 : i32
    %c0_i32_0 = arith.constant 0 : i32
    %c0_i32_1 = arith.constant 0 : i32
    %c0_i32_2 = arith.constant 0 : i32
    return %c0_i32, %c0_i32_0, %c0_i32_1 : i32, i32, i32
  }
}

</mosaic_0001>

<bundles_post_ra>
// kernel: text_prompt_learner_forward.1
= control target key start
LH: loop header
LB: loop body
LE: loop exit
PB: predicated region body
PF: predicated region fallthrough
CT: control target
= control target key end

     0   :  { %7 = vsyncpa [#allocation5], 0  ;;  %s135_s9 = smov [#allocation4]   ;;  %s195_s0 = inlined_call_operand.hbm [shape: f32[3,4,128], index: 0, kind: input, shape index: {}]   ;;  %s196_s1 = inlined_call_operand.hbm [shape: f32[4,16,128], index: 1, kind: input, shape index: {}, may-alias: {1,2}]   ;;  %s197_s2 = inlined_call_operand.hbm [shape: f32[4,16,128], index: 2, kind: output, shape index: {}, may-alias: {1,2}]  }
   0x1   :  { %s14_s10 = sshll.u32 %s135_s9, 4  ;;  %s84_s13 = scalar_lea.hbm %s195_s0, 64  ;;  %s15_s10 = int_to_ptr.vmem [resolvable:$true] %s14_s10 }
   0x2   :  { %p85_p0 = scmp.ne.s32.totalorder %s195_s0, %s84_s13  ;;  %s86_s18 = scalar_lea.hbm %s195_s0, 192 }
   0x3   :  { %p87_p1 = scmp.lt.u32.totalorder %s86_s18, %s84_s13  ;;  %p88_p2 = scmp.lt.u32.totalorder %s84_s13, %s195_s0 }
   0x5   :  { %p89_p3 = por %p88_p2, %p87_p1 }
   0x7   :  { %p90_p4 = pnand %p89_p3, %p85_p0 }
   0x9   :  { %93 = shalt.err (!%p90_p4)
}
   0xa   :  { %s94_s20 = scalar_lea.vmem %s15_s10, 64  ;;  %p99_p6 = scmp.lt.s32.totalorder %s15_s10, %s15_s10 }
   0xb   :  { %p95_p5 = scmp.ne.s32.totalorder %s15_s10, %s94_s20  ;;  %p100_p7 = scmp.lt.s32.totalorder %s94_s20, %s94_s20 }
   0xd   :  { %p101_p8 = por %p100_p7, %p99_p6 }
   0xf   :  { %p102_p9 = pnand %p101_p8, %p95_p5 }
  0x11   :  { %105 = shalt.err (!%p102_p9)
}
  0x12   :  { %17 = dma.hbm_to_vmem [thread:$0]  %s195_s0, 64, %s15_s10, [#allocation5]  }
  0x13   :  { %131 = dma.done.wait [#allocation5], 64  }
  0x14   :  { %132 = vsyncadd [#allocation5], 4294967232  ;;  %s136_s23 = smov [#allocation2]   ;;  %s173_s27 = scalar_lea.hbm %s197_s2, 16  ;;  %v33_v0 = vld [vmem:[#allocation4] sm:$0xf] }
  0x15   :  { %s47_s24 = sshll.u32 %s136_s23, 4  ;;  %34 = vst [vmem:[#allocation2] sm:$0xf] %v33_v0  ;;  %35 = vst [vmem:[#allocation2 + $0x4] sm:$0xf] %v33_v0  ;;  %s175_s24 = int_to_ptr.vmem [resolvable:$true] %s47_s24 }
  0x16   :  { %36 = vst [vmem:[#allocation2 + $0x8] sm:$0xf] %v33_v0  ;;  %37 = vst [vmem:[#allocation2 + $0xc] sm:$0xf] %v33_v0  ;;  %s106_s0 = scalar_lea.vmem %s175_s24, 256  ;;  %p111_p11 = scmp.lt.s32.totalorder %s175_s24, %s175_s24 }
  0x17   :  { %p107_p10 = scmp.ne.s32.totalorder %s175_s24, %s106_s0  ;;  %p112_p12 = scmp.lt.s32.totalorder %s106_s0, %s106_s0 }
  0x19   :  { %p113_p13 = por %p112_p12, %p111_p11 }
  0x1b   :  { %p114_p0 = pnand %p113_p13, %p107_p10 }
  0x1d   :  { %117 = shalt.err (!%p114_p0)  }
  0x1e   :  { %s130_s30 = scalar_lea.hbm %s197_s2, 272  ;;  %s120_s5 = scalar_lea.hbm %s197_s2, 1024 }
  0x1f   :  { %p119_p1 = scmp.ne.s32.totalorder %s173_s27, %s130_s30  ;;  %p121_p2 = scmp.lt.u32.totalorder %s173_s27, %s197_s2 }
  0x20   :  { %p122_p3 = scmp.lt.u32.totalorder %s120_s5, %s130_s30  ;;  %p124_p5 = scmp.lt.u32.totalorder %s130_s30, %s173_s27 }
  0x22   :  { %p123_p4 = por %p122_p3, %p121_p2 }
  0x24   :  { %p125_p6 = por %p124_p5, %p123_p4 }
  0x26   :  { %p126_p7 = pnand %p125_p6, %p119_p1 }
  0x28   :  { %129 = shalt.err (!%p126_p7)  }
  0x29   :  { %s137_s8 = smov 64   ;;  %s138_s9 = smov 256  }
  0x2a   :  { %s139_s10 = smov 4  }
  0x2b   :  { %50 = dma.vmem_to_hbm [thread:$0]  %s175_s24, 256, %s173_s27, [#allocation3], %s137_s8, %s138_s9, %s139_s10 }
  0x2c   :  { %133 = dma.done.wait [#allocation3], 256 }
  0x2d   :  { %134 = vsyncadd [#allocation3], 4294967040 }
  0x2e   :  { %58 = vsyncpa [#allocation5], 1 }
  0x2f   :  { %59 = vsyncmov [#allocation3] }
  0x32   :  { %s60_s11 = vpop.sfrf %59 }
  0x33   :  { %p77_p8 = scmp.ne.s32.totalorder %s60_s11, 0 }
  0x35   :  { %64 = shalt.err (%p77_p8)  }
  0x36   :  { %66 = vsyncmov [#allocation3 + $0x1] }
  0x39   :  { %s67_s2 = vpop.sfrf %66 }
  0x3a   :  { %p78_p9 = scmp.ne.s32.totalorder %s67_s2, 0 }
  0x3c   :  { %71 = shalt.err (%p78_p9)  }

</bundles_post_ra>
